<compile_context>
chip_gen: v5e
topology: v5e:2x2
jax: 0.10.0
libtpu: 0.0.40
codegen_flags: <defaults>
</compile_context>

<pallas_src>
import jax
import jax.numpy as jnp
from jax.experimental import pallas as pl
from jax.experimental.pallas import tpu as pltpu


def _round_up(x, m):
    return ((x + m - 1) // m) * m


def _vmem_capacity_bytes():
    """Physical VMEM per TensorCore (generation-aware), with a conservative fallback."""
    try:
        info = pltpu.get_tpu_info()
        cap = getattr(info, "vmem_capacity_bytes", None)
        if cap:
            return int(cap)
    except Exception:
        pass
    return 64 * 1024 * 1024  # conservative: v7x per-TC physical VMEM


def _resident_block_spec(block_shape, index_map):
    """Spec for an operand whose block never changes across the grid: single-buffered
    (pl.Buffered(1)) to halve its VMEM footprint; falls back to the default
    (double-buffered) spec on jax versions without pipeline_mode support."""
    try:
        return pl.BlockSpec(block_shape, index_map, pipeline_mode=pl.Buffered(1))
    except Exception:
        return pl.BlockSpec(block_shape, index_map)


# ----------------------------- kernels ---------------------------------------


def _fused_kernel(x_ref, w_ref, b_ref, out_ref):
    # x_ref  : (TB, K)  bf16 batch tile of flattened x (K full-extent)
    # w_ref  : (K, O)   fused weight, resident (constant index_map)
    # b_ref  : (1, O)   fused bias, resident
    # out_ref: (TB, O)  f32 output tile (true O, no lane padding of the HBM array)
    out_ref[...] = (
        jnp.dot(x_ref[...], w_ref[...], preferred_element_type=jnp.float32)
        + b_ref[...]
    ).astype(out_ref.dtype)


def _fused_ktiled_kernel(x_ref, w_ref, b_ref, out_ref, acc_ref):
    # Grid = (batch tiles [parallel], K tiles [arbitrary]); acc_ref persists across K.
    k = pl.program_id(1)

    @pl.when(k == 0)
    def _init():
        acc_ref[...] = jnp.zeros_like(acc_ref)

    acc_ref[...] += jnp.dot(x_ref[...], w_ref[...], preferred_element_type=jnp.float32)

    @pl.when(k == pl.num_programs(1) - 1)
    def _finalize():
        out_ref[...] = (acc_ref[...] + b_ref[...]).astype(out_ref.dtype)


# ---------------------- parameter prep (call-path hoisted) -------------------


def prepare_params(w1, b1, w2, b2, compute_dtype=jnp.bfloat16):
    """Fold both Linear stages into a single matmul. Do this ONCE per set of weights.

    w1 : (N, S) row n == linear_layers[n].weight[0]
    b1 : (N,)
    w2 : (O, N) final_fc.weight (PyTorch layout)
    b2 : (O,)
    """
    N, S = w1.shape
    O = w2.shape[0]
    K = N * S
    w1f = w1.astype(jnp.float32)
    w2f = w2.astype(jnp.float32)
    w_eff = (w1f[:, :, None] * w2f.T[:, None, :]).reshape(K, O)      # exact algebraic fusion
    b_eff = (b2.astype(jnp.float32) + b1.astype(jnp.float32) @ w2f.T).reshape(1, O)
    return {"w_eff": w_eff.astype(compute_dtype), "b_eff": b_eff}


# ------------------------------- wrapper --------------------------------------


def single_sample_linear_nn_fused(x, w_eff, b_eff, *, force_path=None):
    """Forward pass. x: (B, N, S); w_eff: (N*S, O); b_eff: (1, O) -> (B, O) float32."""
    B, N, S = x.shape
    K, O = w_eff.shape
    if K != N * S:
        raise ValueError(f"w_eff rows ({K}) must equal N*S ({N * S})")

    cdt = w_eff.dtype
    xbytes = jnp.dtype(cdt).itemsize
    obytes = 4  # f32 output / bias / accumulator

    # Layout-free reshape; the cast is the only wrapper-side op on x and may be fused
    # into the kernel call via allow_input_fusion.
    x2d = x.reshape(B, K).astype(cdt)
    b_eff = b_eff.astype(jnp.float32).reshape(1, O)

    # Generation-aware scoped-VMEM budget (v5e/v6e: 128 MiB phys; v7x: 64 MiB phys).
    vmem_limit = int(min((_vmem_capacity_bytes() * 3) // 4, 96 * 1024 * 1024))
    usable = max(vmem_limit - (2 << 20), 4 << 20)  # headroom, never negative

    # Size conservatively as if the weight were still double-buffered, so the kernel
    # cannot OOM even if Buffered(1) is unavailable on this jax version.
    w_resident = 2 * (K * O * xbytes + O * obytes)

    use_resident = w_resident <= usable // 2
    if force_path == "resident":
        use_resident = True
    elif force_path == "ktiled":
        use_resident = False

    if use_resident:
        # ------ Path A: fused weight resident in VMEM, 1-D batch-tiled grid ------
        target_tile_bytes = 4 << 20                       # ~4 MiB x tile per buffer
        per_row = 2 * K * xbytes + 2 * O * obytes         # dbl-buffered x row + out row
        max_tb = max(8, (usable - w_resident) // per_row)
        tb_cap = min(max_tb, max(8, target_tile_bytes // max(K * xbytes, 1)))

        if B <= tb_cap:
            TB, grid_b = B, 1                             # full-extent batch block, no padding
        else:
            TB = max(8, (tb_cap // 8) * 8)
            grid_b = pl.cdiv(B, TB)                       # ragged last block: masked by Pallas
        if grid_b < 2 and B >= 16:
            # Give both v7x TensorCores work (harmless single extra step on v5e/v6e).
            TB = _round_up(pl.cdiv(B, 2), 8)
            grid_b = pl.cdiv(B, TB)

        cost = pl.CostEstimate(
            flops=2 * B * K * O,
            transcendentals=0,
            bytes_accessed=B * K * xbytes + K * O * xbytes + O * obytes + B * O * obytes,
        )
        return pl.pallas_call(
            _fused_kernel,
            out_shape=jax.ShapeDtypeStruct((B, O), jnp.float32),
            grid=(grid_b,),
            in_specs=[
                pl.BlockSpec((TB, K), lambda i: (i, 0)),            # x tile streams over batch
                _resident_block_spec((K, O), lambda i: (0, 0)),     # fused weight, resident
                _resident_block_spec((1, O), lambda i: (0, 0)),     # fused bias, resident
            ],
            out_specs=pl.BlockSpec((TB, O), lambda i: (i, 0)),
            compiler_params=pltpu.CompilerParams(
                dimension_semantics=("parallel",),
                vmem_limit_bytes=vmem_limit,
                allow_input_fusion=[True, True, True],
            ),
            cost_estimate=cost,
        )(x2d, w_eff, b_eff)

    # ------ Path B: K-tiled fallback (fused weight too large to keep resident) ------
    # K must be an exact multiple of TK here (zero padding is numerically exact);
    # a ragged K block would feed garbage into the accumulation.
    TK = min(2048, _round_up(K, 128))
    while TK > 128 and 2 * TK * O * xbytes > usable // 2:
        TK = max(128, ((TK // 2) // 128) * 128)
    K_pad = _round_up(K, TK)

    per_row = 2 * TK * xbytes + 2 * O * obytes + O * obytes   # dbl x + dbl out + acc
    rem = usable - 2 * (TK * O * xbytes) - 2 * O * obytes
    max_tb = max(8, rem // per_row)
    TB = min(max_tb, max(8, (4 << 20) // max(TK * xbytes, 1)))
    if B <= TB:
        TB, grid_b = B, 1
    else:
        TB = max(8, (TB // 8) * 8)
        grid_b = pl.cdiv(B, TB)
    if grid_b < 2 and B >= 16:
        TB = _round_up(pl.cdiv(B, 2), 8)
        grid_b = pl.cdiv(B, TB)

    if K_pad != K:
        x_in = jnp.zeros((B, K_pad), cdt).at[:, :K].set(x2d)
        w_in = jnp.zeros((K_pad, O), cdt).at[:K, :].set(w_eff)
    else:
        x_in, w_in = x2d, w_eff

    cost = pl.CostEstimate(
        flops=2 * B * K_pad * O,
        transcendentals=0,
        bytes_accessed=B * K_pad * xbytes + K_pad * O * xbytes + O * obytes + B * O * obytes,
    )
    return pl.pallas_call(
        _fused_ktiled_kernel,
        out_shape=jax.ShapeDtypeStruct((B, O), jnp.float32),
        grid=(grid_b, K_pad // TK),
        in_specs=[
            pl.BlockSpec((TB, TK), lambda i, k: (i, k)),
            pl.BlockSpec((TK, O), lambda i, k: (k, 0)),
            _resident_block_spec((1, O), lambda i, k: (0, 0)),
        ],
        out_specs=pl.BlockSpec((TB, O), lambda i, k: (i, 0)),
        scratch_shapes=[pltpu.VMEM((TB, O), jnp.float32)],
        compiler_params=pltpu.CompilerParams(
            dimension_semantics=("parallel", "arbitrary"),
            vmem_limit_bytes=vmem_limit,
            allow_input_fusion=[True, True, True],
        ),
        cost_estimate=cost,
    )(x_in, w_in, b_eff)


def single_sample_linear_nn(x, w1, b1, w2, b2, compute_dtype=jnp.bfloat16):
    """Convenience API mirroring the PyTorch module (prep + fused forward in one call).
    Prefer prepare_params() once + single_sample_linear_nn_fused() under jit."""
    p = prepare_params(w1, b1, w2, b2, compute_dtype=compute_dtype)
    return single_sample_linear_nn_fused(x, p["w_eff"], p["b_eff"])


def reference_forward(x, w1, b1, w2, b2):
    """Pure-JAX f32 reference mirroring the (unfused) PyTorch forward."""
    y = jnp.einsum("bns,ns->bn", x, w1) + b1[None, :]
    return y @ w2.T + b2[None, :]


if __name__ == "__main__":
    # Small shapes consistent with the module's forward.
    batch = 2
    num_neurons = 8
    sequence_length = 16
    output_size = 4

    key = jax.random.PRNGKey(0)
    kx, kw1, kb1, kw2, kb2 = jax.random.split(key, 5)

    x = jax.random.normal(kx, (batch, num_neurons, sequence_length), dtype=jnp.float32)

    # Deterministic synthetic parameters (uniform init like nn.Linear defaults).
    bound1 = 1.0 / jnp.sqrt(sequence_length)
    w1 = jax.random.uniform(kw1, (num_neurons, sequence_length),
                            minval=-bound1, maxval=bound1, dtype=jnp.float32)
    b1 = jax.random.uniform(kb1, (num_neurons,),
                            minval=-bound1, maxval=bound1, dtype=jnp.float32)
    bound2 = 1.0 / jnp.sqrt(num_neurons)
    w2 = jax.random.uniform(kw2, (output_size, num_neurons),
                            minval=-bound2, maxval=bound2, dtype=jnp.float32)
    b2 = jax.random.uniform(kb2, (output_size,),
                            minval=-bound2, maxval=bound2, dtype=jnp.float32)

    # Hoist fused-weight construction out of the per-call path; jit the forward.
    params = prepare_params(w1, b1, w2, b2)  # bf16 compute, f32 bias/accumulate
    w_eff, b_eff = params["w_eff"], params["b_eff"]

    fwd = jax.jit(lambda xx: single_sample_linear_nn_fused(xx, w_eff, b_eff))
    out = jax.block_until_ready(fwd(x))

    ref = reference_forward(x, w1, b1, w2, b2)
    assert out.shape == (batch, output_size)
    # bf16 inputs with f32 accumulation -> loosened tolerance vs the f32 reference.
    assert jnp.allclose(out, ref, atol=3e-2, rtol=3e-2), "resident path mismatch vs reference"

    # Also exercise the K-tiled fallback path (used when the fused weight would not
    # fit resident in VMEM, e.g. large N*S*O on v7x).
    fwd_kt = jax.jit(lambda xx: single_sample_linear_nn_fused(xx, w_eff, b_eff,
                                                              force_path="ktiled"))
    out_kt = jax.block_until_ready(fwd_kt(x))
    assert jnp.allclose(out_kt, ref, atol=3e-2, rtol=3e-2), "K-tiled path mismatch vs reference"

    print("KERNEL_OK")
</pallas_src>

<mosaic_0001>
module attributes {stable_mosaic.version = 11 : i64} {
  func.func @_fused_kernel(%arg0: i32, %arg1: memref<2x128xbf16, #tpu.memory_space<vmem>>, %arg2: memref<128x4xbf16, #tpu.memory_space<vmem>>, %arg3: memref<1x4xf32, #tpu.memory_space<vmem>>, %arg4: memref<2x4xf32, #tpu.memory_space<vmem>>) attributes {dimension_semantics = [#tpu.dimension_semantics<parallel>], iteration_bounds = array<i64: 1>, scalar_prefetch = 0 : i64, scratch_operands = 0 : i64, tpu.core_type = #tpu.core_type<tc>, window_params = [{transform_indices = @transform_0, window_bounds = array<i64: 2, 128>}, {pipeline_mode = #tpu.pipeline_mode<synchronous>, transform_indices = @transform_1, window_bounds = array<i64: 128, 4>}, {pipeline_mode = #tpu.pipeline_mode<synchronous>, transform_indices = @transform_2, window_bounds = array<i64: 1, 4>}, {transform_indices = @transform_3, window_bounds = array<i64: 2, 4>}]} {
    %c0 = arith.constant 0 : index
    %c0_0 = arith.constant 0 : index
    %0 = vector.load %arg1[%c0, %c0_0] : memref<2x128xbf16, #tpu.memory_space<vmem>>, vector<2x128xbf16>
    %c0_1 = arith.constant 0 : index
    %c0_2 = arith.constant 0 : index
    %1 = vector.load %arg2[%c0_1, %c0_2] : memref<128x4xbf16, #tpu.memory_space<vmem>>, vector<128x4xbf16>
    %cst = arith.constant dense<0.000000e+00> : vector<2x4xf32>
    %2 = tpu.matmul %0, %1, %cst {dimension_numbers = #tpu.dot_dimension_numbers<[1], [0], [0], [1], [0, 0, 1, 1], [], []>} : vector<2x128xbf16>, vector<128x4xbf16>, vector<2x4xf32> -> vector<2x4xf32>
    %c0_3 = arith.constant 0 : index
    %c0_4 = arith.constant 0 : index
    %3 = vector.load %arg3[%c0_3, %c0_4] : memref<1x4xf32, #tpu.memory_space<vmem>>, vector<1x4xf32>
    %4 = vector.broadcast %3 : vector<1x4xf32> to vector<2x4xf32>
    %5 = arith.addf %2, %4 : vector<2x4xf32>
    %c0_5 = arith.constant 0 : index
    %c0_6 = arith.constant 0 : index
    %6 = vector.load %arg4[%c0_5, %c0_6] : memref<2x4xf32, #tpu.memory_space<vmem>>, vector<2x4xf32>
    tpu.vector_store %arg4[%c0_5, %c0_6], %5 {strides = array<i32>} : memref<2x4xf32, #tpu.memory_space<vmem>>, vector<2x4xf32>,
    return
  }
  func.func @transform_0(%arg0: i32) -> (i32, i32) {
    %c0_i32 = arith.constant 0 : i32
    %c0_i32_0 = arith.constant 0 : i32
    return %arg0, %c0_i32 : i32, i32
  }
  func.func @transform_1(%arg0: i32) -> (i32, i32) {
    %c0_i32 = arith.constant 0 : i32
    %c0_i32_0 = arith.constant 0 : i32
    %c0_i32_1 = arith.constant 0 : i32
    return %c0_i32, %c0_i32_0 : i32, i32
  }
  func.func @transform_2(%arg0: i32) -> (i32, i32) {
    %c0_i32 = arith.constant 0 : i32
    %c0_i32_0 = arith.constant 0 : i32
    %c0_i32_1 = arith.constant 0 : i32
    return %c0_i32, %c0_i32_0 : i32, i32
  }
  func.func @transform_3(%arg0: i32) -> (i32, i32) {
    %c0_i32 = arith.constant 0 : i32
    %c0_i32_0 = arith.constant 0 : i32
    return %arg0, %c0_i32 : i32, i32
  }
}

</mosaic_0001>

<bundles_post_ra>
// kernel: _lambda_.1
= control target key start
LH: loop header
LB: loop body
LE: loop exit
PB: predicated region body
PF: predicated region fallthrough
CT: control target
= control target key end

     0   :  { %8 = vsyncpa [#allocation3], 0  ;;  %s265_s0 = inlined_call_operand.vmem [shape: bf16[2,128], index: 0, kind: input, shape index: {}]   ;;  %s266_s1 = inlined_call_operand.hbm [shape: bf16[128,4], index: 1, kind: input, shape index: {}]   ;;  %s267_s2 = inlined_call_operand.vmem [shape: f32[1,4], index: 2, kind: input, shape index: {}]   ;;  %s268_s3 = inlined_call_operand.hbm [shape: f32[2,4], index: 3, kind: output, shape index: {}]  }
   0x1   :  { %9 = vsyncpa [#allocation4], 0  ;;  %s16_s14 = sshll.u32 %s266_s1, 4  ;;  %s229_s15 = smov [#allocation2]   ;;  %s17_s14 = int_to_ptr.hbm [resolvable:$true] %s16_s14 }
   0x2   :  { %s18_s16 = sshll.u32 %s229_s15, 4  ;;  %s230_s17 = smov 64   ;;  %s19_s16 = int_to_ptr.vmem [resolvable:$true] %s18_s16 }
   0x3   :  { %s231_s18 = smov 4  }
   0x4   :  { %24 = dma.hbm_to_vmem [thread:$0]  %s17_s14, 1024, %s19_s16, [#allocation3], %s230_s17, %s230_s17, %s231_s18  }
   0x5   :  { %225 = dma.done.wait [#allocation3], 1024  }
   0x6   :  { %226 = vsyncadd [#allocation3], 4294966272  ;;  %v171_v0 = vld [vmem:[#allocation2 + $0x38] sm:$0xff]  ;;  %v170_v1 = vld [vmem:[#allocation2 + $0x30] sm:$0xff]  ;;  %s232_s22 = smov [#allocation5]   ;;  %s122_s26 = sshll.u32 %s268_s3, 4  ;;  %s123_s26 = int_to_ptr.hbm [resolvable:$true] %s122_s26 }
   0x7   :  { %100 = vmatpush.bf16.msra.mxu0 %v171_v0  ;;  %v169_v2 = vld [vmem:[#allocation2 + $0x28] sm:$0xff]  ;;  %v168_v3 = vld [vmem:[#allocation2 + $0x20] sm:$0xff]  ;;  %v167_v4 = vld [vmem:[#allocation2 + $0x18] sm:$0xff]  ;;  %s120_s23 = sshll.u32 %s232_s22, 4  ;;  %vm113_vm0 = vcmask 25600   ;;  %s121_s23 = int_to_ptr.vmem [resolvable:$true] %s120_s23 }
   0x8   :  { %v166_v5 = vld [vmem:[#allocation2 + $0x10] sm:$0xff]  ;;  %v165_v6 = vld [vmem:[#allocation2 + $0x8] sm:$0xff]  ;;  %v164_v7 = vld [vmem:[#allocation2] sm:$0xff] }
   0x9   :  { %v31_v8 = vld [vmem:[%s265_s0] sm:$0x1] }
   0xa   :  { %v176_v9 = vld [vmem:[%s267_s2] ss:$0 sm:$0xff] }
   0xb   :  { %101 = vmatpush.bf16.msra.mxu0 %v170_v1 }
   0xf   :  { %102 = vmatpush.bf16.msra.mxu0 %v169_v2 }
  0x13   :  { %103 = vmatpush.bf16.msra.mxu0 %v168_v3 }
  0x17   :  { %104 = vmatpush.bf16.msra.mxu0 %v167_v4 }
  0x1b   :  { %105 = vmatpush.bf16.msra.mxu0 %v166_v5 }
  0x1f   :  { %106 = vmatpush.bf16.msra.mxu0 %v165_v6 }
  0x23   :  { %107 = vmatpush.bf16.msra.mxu0 %v164_v7 }
  0x26   :  { %108 = vmatmul.bf16.vlgmr.msra.gmra.mxu0 %v31_v8 }
  0xa3   :  { %v109_v10 = vpop.f32.mrf.mxu0 }
  0xa4   :  { %v110_v11 = vadd.f32 %v176_v9, %v109_v10 }
  0xa6   :  { %114 = vst.msk [vmem:[#allocation5] sm:$0x3] %vm113_vm0, %v110_v11 }
  0xa7   :  { %125 = dma.vmem_to_hbm [thread:$0]  %s121_s23, 32, %s123_s26, [#allocation4]  }
  0xab   :  { %v111_v12 = vpop.f32.mrf.mxu0 }
  0xac   :  { %227 = dma.done.wait [#allocation4], 32  }
  0xad   :  { %228 = vsyncadd [#allocation4], 4294967264 }
  0xae   :  { %130 = vsyncpa [#allocation3], 1 }
  0xaf   :  { %131 = vsyncpa [#allocation4], 1 }

</bundles_post_ra>
